<compile_context>
chip_gen: v7x
topology: tpu7x:2x2x1
jax: 0.10.0
libtpu: 0.0.40
codegen_flags: <defaults>
</compile_context>

<pallas_src>
import math
import functools

import jax
import jax.numpy as jnp
from jax import lax
from jax.experimental import pallas as pl
from jax.experimental.pallas import tpu as pltpu

_INV_SQRT2 = 0.7071067811865476
_VMEM_BUDGET = 32 << 20   # pick tiles so the working set stays portable (v7x)
_VMEM_CAP = 48 << 20


def _round_up(x, m):
    return ((x + m - 1) // m) * m


def _gelu_erf(x):
    # Exact erf GELU (torch.nn.GELU default), computed in f32.
    return 0.5 * x * (1.0 + lax.erf(x * _INV_SQRT2))


def _mlp_kernel_fused(x_ref, wfc_ref, bfc_ref, wproj_ref, bproj_ref, o_ref):
    """Grid = (row_tiles,). Full weights resident in VMEM."""
    hid = jnp.dot(x_ref[...], wfc_ref[...], preferred_element_type=jnp.float32)
    hid = _gelu_erf(hid + bfc_ref[...].astype(jnp.float32))
    out = jnp.dot(hid.astype(wproj_ref.dtype), wproj_ref[...],
                  preferred_element_type=jnp.float32)
    o_ref[...] = (out + bproj_ref[...].astype(jnp.float32)).astype(o_ref.dtype)


def _mlp_kernel_split(x_ref, wfc_ref, bfc_ref, wproj_ref, bproj_ref, o_ref, acc_ref):
    """Grid = (row_tiles, hidden_chunks); hidden axis is the reduction axis."""
    h_idx = pl.program_id(1)

    @pl.when(h_idx == 0)
    def _():
        acc_ref[...] = jnp.zeros_like(acc_ref)

    # c_fc on one hidden chunk: (tm, Wp) @ (Wp, tH) -> f32, bias in f32.
    hid = jnp.dot(x_ref[...], wfc_ref[...], preferred_element_type=jnp.float32)
    hid = _gelu_erf(hid + bfc_ref[...].astype(jnp.float32))

    # c_proj partial product: (tm, tH) @ (tH, Wp), accumulated in f32 VMEM.
    acc_ref[...] += jnp.dot(
        hid.astype(wproj_ref.dtype), wproj_ref[...],
        preferred_element_type=jnp.float32,
    )

    @pl.when(h_idx == pl.num_programs(1) - 1)
    def _():
        o_ref[...] = (acc_ref[...] + bproj_ref[...].astype(jnp.float32)).astype(o_ref.dtype)


def _fused_footprint(tm, W_p, H_p, cb, ob):
    return (
        2 * tm * W_p * cb            # x tile (double-buffered)
        + 2 * W_p * H_p * cb         # W_fc (resident, but buffered)
        + 2 * H_p * W_p * cb         # W_proj
        + 2 * (H_p + W_p) * 4        # biases
        + 2 * tm * W_p * ob          # out tile
        + tm * H_p * (4 + cb)        # hidden intermediates (f32 + bf16 copy)
    )


def _split_footprint(tm, th, W_p, ob, cb):
    return (
        2 * tm * W_p * cb            # x tile
        + 2 * W_p * th * cb          # W_fc chunk
        + 2 * th * W_p * cb          # W_proj chunk
        + 2 * (th + W_p) * 4         # biases
        + 2 * tm * W_p * ob          # out tile
        + tm * W_p * 4               # f32 accumulator
        + tm * th * (4 + cb)         # hidden chunk intermediates
    )


@functools.partial(jax.jit, static_argnames=("tm", "th", "compute_dtype"))
def mlp_pallas(x, w_fc, b_fc, w_proj, b_proj, *, tm=None, th=None,
               compute_dtype=jnp.bfloat16):
    """x: (B, T, W). w_fc: (W, 4W), b_fc: (1, 4W), w_proj: (4W, W), b_proj: (1, W).

    tm: row-tile override (default: min(256, rows)). th: hidden-chunk override;
    None = auto (prefer the fused, no-chunking path when it fits in VMEM).
    """
    B, T, W = x.shape
    H = w_fc.shape[1]
    M = B * T
    out_dtype = x.dtype
    cb = jnp.dtype(compute_dtype).itemsize
    ob = jnp.dtype(out_dtype).itemsize

    # Lane-dense feature dims: pad W and H up to multiples of 128.
    W_p = _round_up(W, 128)
    H_p = _round_up(H, 128)

    # Row tile: sublane-aligned, but don't over-pad tiny inputs.
    tm = min(tm if tm is not None else 256, _round_up(M, 8))
    tm = _round_up(tm, 8)
    M_p = _round_up(M, tm)

    # Zero-padding keeps the math exact: padded x cols / W_fc rows are 0,
    # GELU(0 + 0) = 0, padded W_proj rows/cols are 0, padded outputs sliced off.
    x2d = jnp.pad(x.reshape(M, W), ((0, M_p - M), (0, W_p - W))).astype(compute_dtype)
    wfc_p = jnp.pad(w_fc, ((0, W_p - W), (0, H_p - H))).astype(compute_dtype)
    bfc_p = jnp.pad(b_fc, ((0, 0), (0, H_p - H))).astype(jnp.float32)
    wproj_p = jnp.pad(w_proj, ((0, H_p - H), (0, W_p - W))).astype(compute_dtype)
    bproj_p = jnp.pad(b_proj, ((0, 0), (0, W_p - W))).astype(jnp.float32)

    n_row_tiles = M_p // tm
    use_fused = (th is None) and (_fused_footprint(tm, W_p, H_p, cb, ob) <= _VMEM_BUDGET)

    if use_fused:
        footprint = _fused_footprint(tm, W_p, H_p, cb, ob)
        vmem_limit = int(min(_VMEM_CAP, max(footprint * 3 // 2 + (4 << 20), 16 << 20)))
        cost = pl.CostEstimate(
            flops=4 * M_p * W_p * H_p,
            transcendentals=M_p * H_p,
            bytes_accessed=(M_p * W_p * (cb + ob) + 2 * W_p * H_p * cb
                            + (H_p + W_p) * 4),
        )
        out = pl.pallas_call(
            _mlp_kernel_fused,
            out_shape=jax.ShapeDtypeStruct((M_p, W_p), out_dtype),
            grid_spec=pltpu.PrefetchScalarGridSpec(
                num_scalar_prefetch=0,
                grid=(n_row_tiles,),
                in_specs=[
                    pl.BlockSpec((tm, W_p), lambda i: (i, 0)),   # x row tile
                    pl.BlockSpec((W_p, H_p), lambda i: (0, 0)),  # W_fc (resident)
                    pl.BlockSpec((1, H_p), lambda i: (0, 0)),    # b_fc
                    pl.BlockSpec((H_p, W_p), lambda i: (0, 0)),  # W_proj (resident)
                    pl.BlockSpec((1, W_p), lambda i: (0, 0)),    # b_proj
                ],
                out_specs=pl.BlockSpec((tm, W_p), lambda i: (i, 0)),
            ),
            compiler_params=pltpu.CompilerParams(
                dimension_semantics=("parallel",),
                vmem_limit_bytes=vmem_limit,
            ),
            cost_estimate=cost,
        )(x2d, wfc_p, bfc_p, wproj_p, bproj_p)
        return out[:M, :W].reshape(B, T, W)

    # Split path: pick the largest hidden chunk (multiple of 128 dividing H_p)
    # that keeps the working set under budget, or honor an explicit th.
    if th is None:
        th = H_p
        while th > 128 and (H_p % th != 0
                            or _split_footprint(tm, th, W_p, ob, cb) > _VMEM_BUDGET):
            th -= 128
    else:
        th = max(128, (min(th, H_p) // 128) * 128)
        while H_p % th != 0:
            th -= 128

    footprint = _split_footprint(tm, th, W_p, ob, cb)
    vmem_limit = int(min(_VMEM_CAP, max(footprint * 3 // 2 + (4 << 20), 16 << 20)))
    cost = pl.CostEstimate(
        flops=4 * M_p * W_p * H_p,              # two matmuls: 2*M*K*N each
        transcendentals=M_p * H_p,              # erf over the hidden activations
        bytes_accessed=(M_p * W_p * (cb + ob)
                        + n_row_tiles * 2 * W_p * H_p * cb
                        + (H_p + W_p) * 4),
    )

    out = pl.pallas_call(
        _mlp_kernel_split,
        out_shape=jax.ShapeDtypeStruct((M_p, W_p), out_dtype),
        grid_spec=pltpu.PrefetchScalarGridSpec(
            num_scalar_prefetch=0,
            grid=(n_row_tiles, H_p // th),
            in_specs=[
                pl.BlockSpec((tm, W_p), lambda i, h: (i, 0)),   # x row tile
                pl.BlockSpec((W_p, th), lambda i, h: (0, h)),   # W_fc hidden chunk
                pl.BlockSpec((1, th), lambda i, h: (0, h)),     # b_fc chunk
                pl.BlockSpec((th, W_p), lambda i, h: (h, 0)),   # W_proj hidden chunk
                pl.BlockSpec((1, W_p), lambda i, h: (0, 0)),    # b_proj
            ],
            out_specs=pl.BlockSpec((tm, W_p), lambda i, h: (i, 0)),
            scratch_shapes=[pltpu.VMEM((tm, W_p), jnp.float32)],
        ),
        compiler_params=pltpu.CompilerParams(
            dimension_semantics=("parallel", "arbitrary"),
            vmem_limit_bytes=vmem_limit,
        ),
        cost_estimate=cost,
    )(x2d, wfc_p, bfc_p, wproj_p, bproj_p)

    return out[:M, :W].reshape(B, T, W)


def init_mlp_params(key, width, dtype=jnp.float32):
    """Deterministic init matching torch.nn.Linear's U(-1/sqrt(fan_in), ...)."""
    hidden = width * 4
    k1, k2, k3, k4 = jax.random.split(key, 4)
    bound_fc = 1.0 / math.sqrt(width)
    bound_proj = 1.0 / math.sqrt(hidden)
    # stored pre-transposed: (in, out)
    w_fc = jax.random.uniform(k1, (width, hidden), dtype, -bound_fc, bound_fc)
    b_fc = jax.random.uniform(k2, (1, hidden), dtype, -bound_fc, bound_fc)
    w_proj = jax.random.uniform(k3, (hidden, width), dtype, -bound_proj, bound_proj)
    b_proj = jax.random.uniform(k4, (1, width), dtype, -bound_proj, bound_proj)
    return w_fc, b_fc, w_proj, b_proj


def mlp_reference(x, w_fc, b_fc, w_proj, b_proj):
    h = jnp.einsum("btw,wh->bth", x, w_fc) + b_fc[0]
    h = 0.5 * h * (1.0 + lax.erf(h * _INV_SQRT2))
    return jnp.einsum("bth,hw->btw", h, w_proj) + b_proj[0]


if __name__ == "__main__":
    key = jax.random.PRNGKey(0)
    kx, kp, kx2, kp2 = jax.random.split(key, 4)

    # Primary small case: batch=2, seq=8, hidden width=32 (MLP inner = 128).
    # Auto path -> fused kernel (weights resident, single grid axis).
    B, T, W = 2, 8, 32
    x = jax.random.normal(kx, (B, T, W), jnp.float32)
    w_fc, b_fc, w_proj, b_proj = init_mlp_params(kp, W)

    out = jax.block_until_ready(mlp_pallas(x, w_fc, b_fc, w_proj, b_proj))
    ref = mlp_reference(x, w_fc, b_fc, w_proj, b_proj)
    assert out.shape == (B, T, W)
    # bf16 MXU inputs with f32 accumulation -> loosen tolerance vs f32 reference.
    assert jnp.allclose(out, ref, atol=2e-2, rtol=2e-2), "mismatch vs reference (case 1)"

    # Second case forcing the split path: multiple row tiles and hidden chunks.
    B2, T2, W2 = 2, 8, 64
    x2 = jax.random.normal(kx2, (B2, T2, W2), jnp.float32)
    p2 = init_mlp_params(kp2, W2)
    out2 = jax.block_until_ready(mlp_pallas(x2, *p2, tm=8, th=128))
    ref2 = mlp_reference(x2, *p2)
    assert jnp.allclose(out2, ref2, atol=2e-2, rtol=2e-2), "mismatch vs reference (case 2)"

    print("KERNEL_OK")
</pallas_src>

<mosaic_0001>
module attributes {stable_mosaic.version = 11 : i64} {
  func.func @_mlp_kernel_fused(%arg0: i32, %arg1: memref<16x128xbf16, #tpu.memory_space<vmem>>, %arg2: memref<128x128xbf16, #tpu.memory_space<vmem>>, %arg3: memref<1x128xf32, #tpu.memory_space<vmem>>, %arg4: memref<128x128xbf16, #tpu.memory_space<vmem>>, %arg5: memref<1x128xf32, #tpu.memory_space<vmem>>, %arg6: memref<16x128xf32, #tpu.memory_space<vmem>>) attributes {dimension_semantics = [#tpu.dimension_semantics<parallel>], iteration_bounds = array<i64: 1>, scalar_prefetch = 0 : i64, scratch_operands = 0 : i64, tpu.core_type = #tpu.core_type<tc>, window_params = [{transform_indices = @transform_0, window_bounds = array<i64: 16, 128>}, {pipeline_mode = #tpu.pipeline_mode<synchronous>, transform_indices = @transform_1, window_bounds = array<i64: 128, 128>}, {pipeline_mode = #tpu.pipeline_mode<synchronous>, transform_indices = @transform_2, window_bounds = array<i64: 1, 128>}, {pipeline_mode = #tpu.pipeline_mode<synchronous>, transform_indices = @transform_3, window_bounds = array<i64: 128, 128>}, {pipeline_mode = #tpu.pipeline_mode<synchronous>, transform_indices = @transform_4, window_bounds = array<i64: 1, 128>}, {transform_indices = @transform_5, window_bounds = array<i64: 16, 128>}]} {
    %c0 = arith.constant 0 : index
    %c0_0 = arith.constant 0 : index
    %0 = vector.load %arg1[%c0, %c0_0] : memref<16x128xbf16, #tpu.memory_space<vmem>>, vector<16x128xbf16>
    %c0_1 = arith.constant 0 : index
    %c0_2 = arith.constant 0 : index
    %1 = vector.load %arg2[%c0_1, %c0_2] : memref<128x128xbf16, #tpu.memory_space<vmem>>, vector<128x128xbf16>
    %cst = arith.constant dense<0.000000e+00> : vector<16x128xf32>
    %2 = tpu.matmul %0, %1, %cst {dimension_numbers = #tpu.dot_dimension_numbers<[1], [0], [0], [1], [0, 0, 1, 1], [], []>} : vector<16x128xbf16>, vector<128x128xbf16>, vector<16x128xf32> -> vector<16x128xf32>
    %c0_3 = arith.constant 0 : index
    %c0_4 = arith.constant 0 : index
    %3 = vector.load %arg3[%c0_3, %c0_4] : memref<1x128xf32, #tpu.memory_space<vmem>>, vector<1x128xf32>
    %4 = vector.broadcast %3 : vector<1x128xf32> to vector<16x128xf32>
    %5 = arith.addf %2, %4 : vector<16x128xf32>
    %cst_5 = arith.constant 5.000000e-01 : f32
    %6 = vector.broadcast %cst_5 : f32 to vector<16x128xf32>
    %7 = arith.mulf %6, %5 : vector<16x128xf32>
    %cst_6 = arith.constant 0.707106769 : f32
    %8 = vector.broadcast %cst_6 : f32 to vector<16x128xf32>
    %9 = arith.mulf %5, %8 : vector<16x128xf32>
    %10 = math.erf %9 : vector<16x128xf32>
    %cst_7 = arith.constant 1.000000e+00 : f32
    %11 = vector.broadcast %cst_7 : f32 to vector<16x128xf32>
    %12 = arith.addf %11, %10 : vector<16x128xf32>
    %13 = arith.mulf %7, %12 : vector<16x128xf32>
    %14 = arith.truncf %13 : vector<16x128xf32> to vector<16x128xbf16>
    %c0_8 = arith.constant 0 : index
    %c0_9 = arith.constant 0 : index
    %15 = vector.load %arg4[%c0_8, %c0_9] : memref<128x128xbf16, #tpu.memory_space<vmem>>, vector<128x128xbf16>
    %cst_10 = arith.constant dense<0.000000e+00> : vector<16x128xf32>
    %16 = tpu.matmul %14, %15, %cst_10 {dimension_numbers = #tpu.dot_dimension_numbers<[1], [0], [0], [1], [0, 0, 1, 1], [], []>} : vector<16x128xbf16>, vector<128x128xbf16>, vector<16x128xf32> -> vector<16x128xf32>
    %c0_11 = arith.constant 0 : index
    %c0_12 = arith.constant 0 : index
    %17 = vector.load %arg5[%c0_11, %c0_12] : memref<1x128xf32, #tpu.memory_space<vmem>>, vector<1x128xf32>
    %18 = vector.broadcast %17 : vector<1x128xf32> to vector<16x128xf32>
    %19 = arith.addf %16, %18 : vector<16x128xf32>
    %c0_13 = arith.constant 0 : index
    %c0_14 = arith.constant 0 : index
    %20 = vector.load %arg6[%c0_13, %c0_14] : memref<16x128xf32, #tpu.memory_space<vmem>>, vector<16x128xf32>
    tpu.vector_store %arg6[%c0_13, %c0_14], %19 {strides = array<i32>} : memref<16x128xf32, #tpu.memory_space<vmem>>, vector<16x128xf32>,
    return
  }
  func.func @transform_0(%arg0: i32) -> (i32, i32) {
    %c0_i32 = arith.constant 0 : i32
    %c0_i32_0 = arith.constant 0 : i32
    return %arg0, %c0_i32 : i32, i32
  }
  func.func @transform_1(%arg0: i32) -> (i32, i32) {
    %c0_i32 = arith.constant 0 : i32
    %c0_i32_0 = arith.constant 0 : i32
    %c0_i32_1 = arith.constant 0 : i32
    return %c0_i32, %c0_i32_0 : i32, i32
  }
  func.func @transform_2(%arg0: i32) -> (i32, i32) {
    %c0_i32 = arith.constant 0 : i32
    %c0_i32_0 = arith.constant 0 : i32
    %c0_i32_1 = arith.constant 0 : i32
    return %c0_i32, %c0_i32_0 : i32, i32
  }
  func.func @transform_3(%arg0: i32) -> (i32, i32) {
    %c0_i32 = arith.constant 0 : i32
    %c0_i32_0 = arith.constant 0 : i32
    %c0_i32_1 = arith.constant 0 : i32
    return %c0_i32, %c0_i32_0 : i32, i32
  }
  func.func @transform_4(%arg0: i32) -> (i32, i32) {
    %c0_i32 = arith.constant 0 : i32
    %c0_i32_0 = arith.constant 0 : i32
    %c0_i32_1 = arith.constant 0 : i32
    return %c0_i32, %c0_i32_0 : i32, i32
  }
  func.func @transform_5(%arg0: i32) -> (i32, i32) {
    %c0_i32 = arith.constant 0 : i32
    %c0_i32_0 = arith.constant 0 : i32
    return %arg0, %c0_i32 : i32, i32
  }
}

</mosaic_0001>

<bundles_post_ra>
// kernel: mlp_pallas.1
= control target key start
LH: loop header
LB: loop body
LE: loop exit
PB: predicated region body
PF: predicated region fallthrough
CT: control target
= control target key end

     0   :  { %v370_v0 = vmov 0.0   ;;  %vm371_vm0 = vmmov 0   ;;  %s465_s1 = inlined_call_operand.vmem [shape: bf16[128,128], index: 1, kind: input, shape index: {}]   ;;  %s466_s3 = inlined_call_operand.vmem [shape: bf16[128,128], index: 3, kind: input, shape index: {}]   ;;  %s467_s0 = inlined_call_operand.vmem [shape: bf16[16,128], index: 0, kind: input, shape index: {}]   ;;  %s468_s2 = inlined_call_operand.vmem [shape: f32[1,128], index: 2, kind: input, shape index: {}]   ;;  %s469_s4 = inlined_call_operand.vmem [shape: f32[1,128], index: 4, kind: input, shape index: {}]   ;;  %s470_s5 = inlined_call_operand.vmem [shape: f32[16,128], index: 5, kind: output, shape index: {}]  }
   0x1   :  { %307 = vmatprep.subr.bf16.mxu0 %v370_v0  ;;  %v349_v1 = vld [vmem:[%s465_s1] sm:$0xff]   ;;  %323 = vmatprep.mubr.msk.bf16.mxu0 %vm371_vm0, %v370_v0  ;;  %v350_v2 = vld [vmem:[%s465_s1 + $0x8] sm:$0xff]   ;;  %v351_v3 = vld [vmem:[%s465_s1 + $0x10] sm:$0xff]  }
   0x2   :  { %327 = vmatprep.subr.bf16.mxu1 %v370_v0  ;;  %343 = vmatprep.mubr.msk.bf16.mxu1 %vm371_vm0, %v370_v0  ;;  %v358_v4 = vld [vmem:[%s466_s3] sm:$0xff]   ;;  %v352_v5 = vld [vmem:[%s465_s1 + $0x18] sm:$0xff]   ;;  %v359_v6 = vld [vmem:[%s466_s3 + $0x8] sm:$0xff]  }
   0x3   :  { %308 = vmatpush3.bf16.msra.mxu0 %v349_v1  ;;  %328 = vmatpush3.bf16.msra.mxu1 %v358_v4  ;;  %v353_v7 = vld [vmem:[%s465_s1 + $0x20] sm:$0xff]   ;;  %v354_v8 = vld [vmem:[%s465_s1 + $0x28] sm:$0xff]   ;;  %v355_v9 = vld [vmem:[%s465_s1 + $0x30] sm:$0xff]  }
   0x4   :  { %309 = vmatprep.subr.bf16.mxu0 %v370_v0  ;;  %329 = vmatprep.subr.bf16.mxu1 %v370_v0  ;;  %v356_v10 = vld [vmem:[%s465_s1 + $0x38] sm:$0xff]   ;;  %v357_v11 = vld [vmem:[%s467_s0] sm:$0xff]   ;;  %v360_v12 = vld [vmem:[%s466_s3 + $0x10] sm:$0xff]  }
   0x5   :  { %v361_v13 = vld [vmem:[%s466_s3 + $0x18] sm:$0xff]   ;;  %v362_v14 = vld [vmem:[%s466_s3 + $0x20] sm:$0xff]   ;;  %v363_v15 = vld [vmem:[%s466_s3 + $0x28] sm:$0xff]  }
   0x6   :  { %v364_v16 = vld [vmem:[%s466_s3 + $0x30] sm:$0xff]   ;;  %v365_v17 = vld [vmem:[%s466_s3 + $0x38] sm:$0xff]   ;;  %v270_v18 = vld [vmem:[%s468_s2] ss:$0 sm:$0xff] }
   0x7   :  { %310 = vmatpush3.bf16.msra.mxu0 %v350_v2  ;;  %330 = vmatpush3.bf16.msra.mxu1 %v359_v6  ;;  %v280_v36 = vld [vmem:[%s469_s4] ss:$0 sm:$0xff] }
   0x8   :  { %311 = vmatprep.subr.bf16.mxu0 %v370_v0  ;;  %331 = vmatprep.subr.bf16.mxu1 %v370_v0 }
   0xb   :  { %312 = vmatpush3.bf16.msra.mxu0 %v351_v3  ;;  %332 = vmatpush3.bf16.msra.mxu1 %v360_v12 }
   0xc   :  { %313 = vmatprep.subr.bf16.mxu0 %v370_v0  ;;  %333 = vmatprep.subr.bf16.mxu1 %v370_v0 }
   0xf   :  { %314 = vmatpush3.bf16.msra.mxu0 %v352_v5  ;;  %334 = vmatpush3.bf16.msra.mxu1 %v361_v13 }
  0x10   :  { %315 = vmatprep.subr.bf16.mxu0 %v370_v0  ;;  %335 = vmatprep.subr.bf16.mxu1 %v370_v0 }
  0x13   :  { %316 = vmatpush3.bf16.msra.mxu0 %v353_v7  ;;  %336 = vmatpush3.bf16.msra.mxu1 %v362_v14 }
  0x14   :  { %317 = vmatprep.subr.bf16.mxu0 %v370_v0  ;;  %337 = vmatprep.subr.bf16.mxu1 %v370_v0 }
  0x17   :  { %318 = vmatpush3.bf16.msra.mxu0 %v354_v8  ;;  %338 = vmatpush3.bf16.msra.mxu1 %v363_v15 }
  0x18   :  { %319 = vmatprep.subr.bf16.mxu0 %v370_v0  ;;  %339 = vmatprep.subr.bf16.mxu1 %v370_v0 }
  0x1b   :  { %320 = vmatpush3.bf16.msra.mxu0 %v355_v9  ;;  %340 = vmatpush3.bf16.msra.mxu1 %v364_v16 }
  0x1c   :  { %321 = vmatprep.subr.bf16.mxu0 %v370_v0  ;;  %341 = vmatprep.subr.bf16.mxu1 %v370_v0 }
  0x1f   :  { %322 = vmatpush3.bf16.msra.mxu0 %v356_v10  ;;  %342 = vmatpush3.bf16.msra.mxu1 %v365_v17 }
  0x22   :  { %324 = vmatmul.mubr.bf16.vlgmr.msra.gmra.mrb[0].mxu0 %v357_v11 }
  0xf5   :  { %v134_v19 = vpop.f32.mrb[0].mxu0 }
  0xf6   :  { %v135_v20 = vadd.f32 %v270_v18, %v134_v19  ;;  %v325_v21 = vpop.f32.mrb[1].mxu0 }
  0xf7   :  { %v137_v22 = vpop.f32.mrb[2].mxu0 }
  0xf8   :  { %v143_v23 = vmul.f32 0.70710677, %v135_v20  ;;  %v138_v24 = vadd.f32 %v270_v18, %v137_v22  ;;  %v326_v25 = vpop.f32.mrb[3].mxu0  ;;  %v141_v30 = vmul.f32 0.5, %v135_v20 }
  0xfa   :  { %366 = verf.f32 %v143_v23  ;;  %v144_v26 = vmul.f32 0.70710677, %v138_v24  ;;  %v142_v31 = vmul.f32 0.5, %v138_v24 }
  0xfc   :  { %368 = verf.f32 %v144_v26 }
 0x104   :  { %v367_v27 = vpop.eup %366 }
 0x105   :  { %v147_v28 = vadd.f32 1.0, %v367_v27 }
 0x106   :  { %v369_v29 = vpop.eup %368 }
 0x107   :  { %v148_v32 = vadd.f32 1.0, %v369_v29  ;;  %v149_v33 = vmul.f32 %v147_v28, %v141_v30 }
 0x109   :  { %v150_v34 = vmul.f32 %v148_v32, %v142_v31 }
 0x10b   :  { %v151_v35 = vpack.c.bf16 %v150_v34, %v149_v33 }
 0x10d   :  { %344 = vmatmul.mubr.bf16.vlgmr.msra.gmra.mrb[0].mxu1 %v151_v35 }
 0x1e0   :  { %v257_v37 = vpop.f32.mrb[0].mxu1 }
 0x1e1   :  { %v258_v38 = vadd.f32 %v280_v36, %v257_v37  ;;  %v345_v39 = vpop.f32.mrb[1].mxu1 }
 0x1e2   :  { %v260_v40 = vpop.f32.mrb[2].mxu1 }
 0x1e3   :  { %264 = vst [vmem:[%s470_s5] sm:$0xff] %v258_v38  ;;  %v261_v41 = vadd.f32 %v280_v36, %v260_v40  ;;  %v346_v42 = vpop.f32.mrb[3].mxu1 }
 0x1e5   :  { %265 = vst [vmem:[%s470_s5 + $0x8] sm:$0xff] %v261_v41 }

</bundles_post_ra>
